<compile_context>
chip_gen: v5e
topology: v5e:2x2
jax: 0.10.0
libtpu: 0.0.40
codegen_flags: <defaults>
</compile_context>

<pallas_src>
import jax
import jax.numpy as jnp
from jax.experimental import pallas as pl
from jax.experimental.pallas import tpu as pltpu


def _interp_pos_embed(pos_embed: jnp.ndarray, N: int, out_dtype) -> jnp.ndarray:
    """F.interpolate(pos_embed, size=N, mode='linear', align_corners=False)[0].

    pos_embed: (1, C, L) -> returns (C, N) in out_dtype. Gather + lerp, no matmul.
    """
    _, C, L = pos_embed.shape
    pos = pos_embed[0].astype(jnp.float32)                     # (C, L)
    n = jnp.arange(N, dtype=jnp.float32)
    src = (n + 0.5) * (float(L) / float(N)) - 0.5
    src = jnp.maximum(src, 0.0)                                # PyTorch clamps negatives
    left = jnp.minimum(jnp.floor(src).astype(jnp.int32), L - 1)
    right = jnp.minimum(left + 1, L - 1)
    frac = src - left.astype(jnp.float32)
    left_vals = jnp.take(pos, left, axis=1)                    # (C, N)
    right_vals = jnp.take(pos, right, axis=1)                  # (C, N)
    interp = left_vals * (1.0 - frac)[None, :] + right_vals * frac[None, :]
    # Cast once to x.dtype (matches running the module in that dtype; ~1 ulp vs f32).
    return interp.astype(out_dtype)


def _vmem_capacity_bytes() -> int:
    """Per-core VMEM capacity; conservative (v7x = 64 MiB) if the query fails."""
    try:
        cap = int(pltpu.get_tpu_info().vmem_capacity_bytes)
        if cap > 0:
            return cap
    except Exception:
        pass
    return 64 * 1024 * 1024


def _lane_fold_factor(C: int, N: int) -> int:
    """Smallest g > 1 dividing C with (g*N) % 128 == 0 (lane-dense fold), else 1."""
    if N % 128 == 0:
        return 1
    for g in range(2, C + 1):
        if C % g == 0 and (g * N) % 128 == 0:
            return g
    # TODO(synk): no lane-dense fold exists for this (C, N); narrow-lane stores
    # remain masked (only matters for small N with C not providing a 128 multiple).
    return 1


def _choose_tiling(B, Cg, Nl, itemsize, target_bytes, min_grid_steps=4):
    """Pick (batches-per-tile, lane-column tile) for ~target_bytes blocks."""
    # Column candidates: full Nl, or divisors of Nl that are multiples of 128
    # (keeps the (8,128) block constraint satisfied when col < Nl).
    col_cands = {Nl}
    c = 128
    while c < Nl:
        if Nl % c == 0:
            col_cands.add(c)
        c += 128
    divisors_b = [d for d in range(1, B + 1) if B % d == 0]

    chosen = None
    for col in sorted(col_cands, reverse=True):        # prefer the widest lane tiles
        fitting = [d for d in divisors_b
                   if d * Cg * col * itemsize <= target_bytes]
        if fitting:
            chosen = (max(fitting), col)
            break
    if chosen is None:
        # Even a single-batch block at the smallest legal column exceeds the budget;
        # take the smallest column anyway (still a multiple of 128 when one exists).
        chosen = (1, min(col_cands))

    bpt, col = chosen
    n_col = Nl // col
    # Keep at least `min_grid_steps` grid steps so both v7x TensorCores get work
    # and the pipeline actually double-buffers.
    while bpt > 1 and (B // bpt) * n_col < min_grid_steps:
        smaller = [d for d in divisors_b if d < bpt]
        if not smaller:
            break
        bpt = max(smaller)
    return bpt, col


def _add_pos_kernel(x_ref, pe_ref, o_ref):
    # x_ref/o_ref: (bpt, Cg, col); pe_ref: (1, Cg, col), VMEM-resident.
    # Leading-dim broadcast add: pure VPU streaming in x's dtype (no f32 upcast).
    o_ref[...] = x_ref[...] + pe_ref[...]


def squeeze_axial_positional_embedding(x: jnp.ndarray,
                                       pos_embed: jnp.ndarray) -> jnp.ndarray:
    """x: (B, C, N); pos_embed: (1, C, L). Returns (B, C, N) in x.dtype."""
    B, C, N = x.shape
    _, Cp, L = pos_embed.shape
    assert Cp == C, "channel mismatch between x and pos_embed"

    # 1) Hoisted interpolation (batch-invariant), computed once, in x's dtype.
    interp = _interp_pos_embed(pos_embed, N, x.dtype)          # (C, N)

    # 2) Lane-dense fold: contiguous reshape (C, N) -> (Cg, Nl) with Nl % 128 == 0
    #    when possible. Same contiguous reshape applies to x; no transposes needed.
    g = _lane_fold_factor(C, N)
    Cg, Nl = C // g, g * N
    x3 = x.reshape(B, Cg, Nl)
    pe3 = interp.reshape(1, Cg, Nl)

    # 3) Generation-aware tile budget and block choice.
    itemsize = jnp.dtype(x.dtype).itemsize
    vmem_cap = _vmem_capacity_bytes()
    target_bytes = (8 * 1024 * 1024 if vmem_cap >= 100 * 1024 * 1024
                    else 4 * 1024 * 1024)
    bpt, col = _choose_tiling(B, Cg, Nl, itemsize, target_bytes)
    n_row = B // bpt
    n_col = Nl // col

    # 4) VMEM accounting: x + out blocks double-buffered, plus the (small)
    #    double-buffered embedding block, plus margin; clamp below physical VMEM.
    x_block_bytes = bpt * Cg * col * itemsize
    pe_block_bytes = Cg * col * itemsize
    needed = 4 * x_block_bytes + 2 * pe_block_bytes + (1 << 20)
    vmem_limit = min(vmem_cap - 8 * 1024 * 1024,
                     max(needed, 32 * 1024 * 1024))
    vmem_limit = max(vmem_limit, needed)   # never under-report what we actually use

    # Column axis is OUTERMOST so the embedding block index is constant across the
    # inner row axis: it is fetched once per column block and then re-used.
    out3 = pl.pallas_call(
        _add_pos_kernel,
        out_shape=jax.ShapeDtypeStruct((B, Cg, Nl), x.dtype),
        grid=(n_col, n_row),
        in_specs=[
            pl.BlockSpec((bpt, Cg, col), lambda j, i: (i, 0, j)),   # streamed x
            pl.BlockSpec((1, Cg, col), lambda j, i: (0, 0, j)),     # resident embed
        ],
        out_specs=pl.BlockSpec((bpt, Cg, col), lambda j, i: (i, 0, j)),
        compiler_params=pltpu.CompilerParams(
            dimension_semantics=("parallel", "parallel"),
            vmem_limit_bytes=int(vmem_limit),
        ),
    )(x3, pe3)

    return out3.reshape(B, C, N)


def _reference(x, pos_embed):
    """Independent pure-JAX reference via dense one-hot interpolation matrix."""
    _, C, L = pos_embed.shape
    N = x.shape[-1]
    n = jnp.arange(N, dtype=jnp.float32)
    src = jnp.maximum((n + 0.5) * (float(L) / float(N)) - 0.5, 0.0)
    left = jnp.minimum(jnp.floor(src).astype(jnp.int32), L - 1)
    right = jnp.minimum(left + 1, L - 1)
    frac = src - left.astype(jnp.float32)
    w_nl = (jax.nn.one_hot(left, L, dtype=jnp.float32) * (1.0 - frac)[:, None]
            + jax.nn.one_hot(right, L, dtype=jnp.float32) * frac[:, None])   # (N, L)
    interp = jnp.einsum("cl,nl->cn", pos_embed[0].astype(jnp.float32), w_nl)
    return x + interp[None].astype(x.dtype)


if __name__ == "__main__":
    B, C, N = 2, 4, 16   # x: (B, C, N)
    L = 8                # pos_embed length ("shape" arg of the module)

    key = jax.random.PRNGKey(0)
    kx, kp = jax.random.split(key)
    x = jax.random.normal(kx, (B, C, N), dtype=jnp.float32)
    pos_embed = jax.random.normal(kp, (1, C, L), dtype=jnp.float32)  # torch.randn analogue

    out = squeeze_axial_positional_embedding(x, pos_embed)
    out = jax.block_until_ready(out)

    ref = _reference(x, pos_embed)
    assert out.shape == (B, C, N)
    assert jnp.allclose(out, ref, atol=1e-5, rtol=1e-5)

    print("KERNEL_OK")
</pallas_src>

<mosaic_0001>
module attributes {stable_mosaic.version = 11 : i64} {
  func.func @_add_pos_kernel(%arg0: i32, %arg1: i32, %arg2: memref<1x4x16xf32, #tpu.memory_space<vmem>>, %arg3: memref<1x4x16xf32, #tpu.memory_space<vmem>>, %arg4: memref<1x4x16xf32, #tpu.memory_space<vmem>>) attributes {dimension_semantics = [#tpu.dimension_semantics<parallel>, #tpu.dimension_semantics<parallel>], iteration_bounds = array<i64: 1, 2>, scalar_prefetch = 0 : i64, scratch_operands = 0 : i64, tpu.core_type = #tpu.core_type<tc>, window_params = [{transform_indices = @transform_0, window_bounds = array<i64: 1, 4, 16>}, {transform_indices = @transform_1, window_bounds = array<i64: 1, 4, 16>}, {transform_indices = @transform_2, window_bounds = array<i64: 1, 4, 16>}]} {
    %c0 = arith.constant 0 : index
    %c0_0 = arith.constant 0 : index
    %c0_1 = arith.constant 0 : index
    %0 = vector.load %arg2[%c0, %c0_0, %c0_1] : memref<1x4x16xf32, #tpu.memory_space<vmem>>, vector<1x4x16xf32>
    %c0_2 = arith.constant 0 : index
    %c0_3 = arith.constant 0 : index
    %c0_4 = arith.constant 0 : index
    %1 = vector.load %arg3[%c0_2, %c0_3, %c0_4] : memref<1x4x16xf32, #tpu.memory_space<vmem>>, vector<1x4x16xf32>
    %2 = arith.addf %0, %1 : vector<1x4x16xf32>
    %c0_5 = arith.constant 0 : index
    %c0_6 = arith.constant 0 : index
    %c0_7 = arith.constant 0 : index
    %3 = vector.load %arg4[%c0_5, %c0_6, %c0_7] : memref<1x4x16xf32, #tpu.memory_space<vmem>>, vector<1x4x16xf32>
    tpu.vector_store %arg4[%c0_5, %c0_6, %c0_7], %2 {strides = array<i32>} : memref<1x4x16xf32, #tpu.memory_space<vmem>>, vector<1x4x16xf32>,
    return
  }
  func.func @transform_0(%arg0: i32, %arg1: i32) -> (i32, i32, i32) {
    %c0_i32 = arith.constant 0 : i32
    %c0_i32_0 = arith.constant 0 : i32
    return %arg1, %c0_i32, %arg0 : i32, i32, i32
  }
  func.func @transform_1(%arg0: i32, %arg1: i32) -> (i32, i32, i32) {
    %c0_i32 = arith.constant 0 : i32
    %c0_i32_0 = arith.constant 0 : i32
    %c0_i32_1 = arith.constant 0 : i32
    return %c0_i32, %c0_i32_0, %arg0 : i32, i32, i32
  }
  func.func @transform_2(%arg0: i32, %arg1: i32) -> (i32, i32, i32) {
    %c0_i32 = arith.constant 0 : i32
    %c0_i32_0 = arith.constant 0 : i32
    return %arg1, %c0_i32, %arg0 : i32, i32, i32
  }
}

</mosaic_0001>

<bundles_post_ra>
// kernel: tpu_custom_call.1
= control target key start
LH: loop header
LB: loop body
LE: loop exit
PB: predicated region body
PF: predicated region fallthrough
CT: control target
= control target key end

     0   :  { %7 = vsyncpa [#allocation3], 0  ;;  %s715_s0 = inlined_call_operand.hbm [shape: f32[2,4,16], index: 0, kind: input, shape index: {}]   ;;  %s716_s1 = inlined_call_operand.hbm [shape: f32[1,4,16], index: 1, kind: input, shape index: {}]   ;;  %s717_s2 = inlined_call_operand.hbm [shape: f32[2,4,16], index: 2, kind: output, shape index: {}]  }
   0x1   :  { %9 = vsyncpa [#allocation3 + $0x1], 0 }
   0x2   :  { %10 = vsyncpa [#allocation6], 0 }
   0x3   :  { %11 = vsyncpa [#allocation4], 0 }
   0x4   :  { %13 = vsyncpa [#allocation4 + $0x1], 0  ;;  %s566_s9 = smov 0   ;;  %s568_s10 = smov 0  }
   0x5   :  { %s570_s11 = smov 0   ;;  %s572_s12 = smov 0  }
   0x6   :  { %s574_s13 = smov 0   ;;  %s576_s14 = smov 0  }
   0x7 LB: > { %s314_s15 = sadd.s32 4294967295, %s548_s14   ;;  %s315_s16 = sadd.s32 4294967294, %s548_s14   ;;  %s548_s14 = sphi %s576_s14, %s19_s14   ;;  %s544_s13 = sphi %s574_s13, %s729_s13   ;;  %s540_s12 = sphi %s572_s12, %s728_s12   ;;  %s536_s11 = sphi %s570_s11, %s727_s11   ;;  %s532_s10 = sphi %s568_s10, %s726_s10   ;;  %s528_s9 = sphi %s566_s9, %s725_s9  }
   0x8   : > { %p53_p0 = scmp.ne.s32.totalorder %s532_s10, %s528_s9  ;;  %p600_p1 = scmp.eq.s32.totalorder %s314_s15, 0 }
   0x9   : > { %p604_p2 = scmp.eq.s32.totalorder %s314_s15, 1  ;;  %p111_p3 = scmp.eq.s32.totalorder %s315_s16, 1 }
   0xa   : > { %p610_p4 = por %p600_p1, %p53_p0  ;;  %p316_p5 = scmp.ge.s32.totalorder %s548_s14, 1 }
   0xb   : > { %p615_p6 = por %p111_p3, %p53_p0  ;;  %p118_p7 = scmp.lt.s32.totalorder %s548_s14, 3 }
   0xc   : > { %s132_s23 = sshll.u32 %s716_s1, 4  ;;  %p318_p9 = scmp.ge.s32.totalorder %s548_s14, 2  ;;  %s133_s23 = int_to_ptr.hbm [resolvable:$true] %s132_s23 }
   0xd   : > { %p623_p8 = pnand %p316_p5, %p118_p7  ;;  %s550_s25 = smov [#allocation5]  }
   0xe   : > { %s134_s26 = sshll.u32 %s550_s25, 4  ;;  %s28_s27 = sadd.s32 1, %s544_s13  ;;  %s135_s26 = int_to_ptr.vmem [resolvable:$true] %s134_s26 }
   0xf   : > { %p337_p10 = pneg %p623_p8  ;;  %p29_p12 = scmp.ge.s32.totalorder %s28_s27, 2 }
  0x10   : > { %s40_s28 = sadd.s32 1, %s536_s11  ;;  %p47_p13 = scmp.ne.s32.totalorder %s536_s11, %s532_s10 }
  0x11   : > { %p338_p11 = pnand %p337_p10, %p600_p1  ;;  %p48_p0 = scmp.eq.s32.totalorder %s548_s14, 0 }
  0x12   : > { %s731_s27 = smov (%p29_p12, %s28_s27), 0  ;;  %p645_p5 = por %p604_p2, %p47_p13 }
  0x13   : > { %340 = dma.hbm_to_vmem [thread:$0]  (!%p338_p11), %s133_s23, 64, %s135_s26, [#allocation6]  }
  0x14   : > { %p639_p3 = por %p48_p0, %p47_p13  ;;  %s35_s3 = ssub.s32 %s544_s13, %s731_s27 }
  0x15   : > { %p350_p7 = scmp.lt.s32.totalorder %s548_s14, 2  ;;  %p38_p10 = scmp.eq.s32.totalorder %s35_s3, 0 }
  0x16   : > { %s145_s4 = sand.u32 1, %s536_s11   ;;  %s320_s7 = sshll.u32 %s544_s13, 2 }
  0x17   : > { %s319_s5 = sshll.u32 %s145_s4, 2  ;;  %s154_s16 = scalar_lea.hbm %s715_s0, %s320_s7 }
  0x18   : > { %s654_s6 = scalar_select %p38_p10, %s536_s11, %s40_s28  }
  0x19   : > { %s149_s21 = scalar_lea.vmem [#allocation2], %s319_s5  ;;  %s156_s18 = sshll.u32 %s154_s16, 4  ;;  %s157_s18 = int_to_ptr.hbm [resolvable:$true] %s156_s18 }
  0x1a   : > { %s158_s22 = sshll.u32 %s149_s21, 4  ;;  %p342_p2 = pnand %p350_p7, %p639_p3  ;;  %s159_s22 = int_to_ptr.vmem [resolvable:$true] %s158_s22 }
  0x1b   : > { %s146_s23 = scalar_lea.sflag [#allocation3], %s145_s4  ;;  %167 = sbr.rel (%p623_p8) target bundleno = 50 (0x32), region = 28 }
  0x1c   : > { %344 = dma.hbm_to_vmem [thread:$0]  (!%p342_p2), %s157_s18, 64, %s159_s22, %s146_s23  }
  0x1d   : > { %s665_s25 = sand.u32 (!%p623_p8), 1, %s532_s10  }
  0x1e   : > { %s322_s26 = sshll.u32 (!%p623_p8), %s665_s25, 2  ;;  %s170_s28 = scalar_lea.sflag (!%p623_p8), [#allocation3], %s665_s25 }
  0x1f   : > { %s173_s3 = scalar_lea.vmem (!%p623_p8), [#allocation2], %s322_s26 }
  0x20   : > { %515 = dma.done.wait (%p610_p4), %s170_s28, 64  }
  0x21   : > { %517 = vsyncadd (%p610_p4), %s170_s28, 4294967232 }
  0x22   : > { %519 = dma.done.wait (%p600_p1), [#allocation6], 64  }
  0x23   : > { %521 = vsyncadd (%p600_p1), [#allocation6], 4294967232  ;;  %s326_s24 = sshll.u32 %s540_s12, 2  ;;  %s199_s7 = scalar_lea.vmem [#allocation7], %s322_s26  ;;  %v200_v0 = vld [vmem:[%s173_s3] sm:$0xf] }
  0x24   : > { %s217_s5 = scalar_lea.hbm %s717_s2, %s326_s24  ;;  %s219_s8 = sshll.u32 %s199_s7, 4  ;;  %v201_v1 = vld [vmem:[#allocation5] sm:$0xf]  ;;  %vm203_vm0 = vcmask 125952   ;;  %s220_s8 = int_to_ptr.vmem [resolvable:$true] %s219_s8 }
  0x25   : > { %s221_s15 = sshll.u32 %s217_s5, 4  ;;  %v202_v2 = vadd.f32 %v201_v1, %v200_v0  ;;  %s206_s17 = scalar_lea.sflag [#allocation4], %s665_s25  ;;  %s222_s15 = int_to_ptr.hbm [resolvable:$true] %s221_s15 }
  0x26   : > { %s476_s19 = sshra.s32 %s222_s15, 4  ;;  %s482_s22 = scalar_lea.hbm %s717_s2, 8  ;;  %s477_s19 = int_to_ptr.hbm [resolvable:$true] %s476_s19 }
  0x27   : > { %204 = vst.msk [vmem:[%s199_s7] sm:$0xf] %vm203_vm0, %v202_v2  ;;  %s478_s16 = scalar_lea.hbm %s477_s19, 4  ;;  %p483_p11 = scmp.lt.s32.totalorder %s477_s19, %s717_s2 }
  0x28   : > { %p479_p1 = scmp.ne.s32.totalorder %s477_s19, %s478_s16  ;;  %p484_p12 = scmp.lt.s32.totalorder %s482_s22, %s478_s16 }
  0x2a   : > { %p480_p4 = pnand %p479_p1, %p645_p5  ;;  %p485_p13 = por %p484_p12, %p483_p11 }
  0x2c   : > { %p481_p8 = pneg %p480_p4 }
  0x2e   : > { %p486_p0 = pnand %p485_p13, %p481_p8 }
  0x30   : > { %489 = shalt.err (!%p486_p0)
}
  0x31   : > { %335 = dma.vmem_to_hbm [thread:$0]  (%p645_p5), %s220_s8, 64, %s222_s15, %s206_s17  }
  0x32 PF: > { %s233_s25 = sand.u32 1, %s528_s9   ;;  %p346_p3 = pnand %p318_p9, %p615_p6 }
  0x33   : > { %s234_s26 = scalar_lea.sflag [#allocation4], %s233_s25 }
  0x34   : > { %p347_p7 = pneg %p346_p3 }
  0x36   : > { %523 = dma.done.wait (%p347_p7), %s234_s26, 64  }
  0x37   : > { %525 = vsyncadd (%p347_p7), %s234_s26, 4294967232  ;;  %s19_s14 = sadd.s32 1, %s548_s14   ;;  %s725_s9 = smov %s532_s10 }
  0x38   : > { %p16_p10 = scmp.ge.s32.totalorder %s19_s14, 4   ;;  %s726_s10 = smov %s536_s11 }
  0x39   : > { %s727_s11 = smov %s654_s6  ;;  %s728_s12 = smov %s544_s13 }
  0x3a   : > { %s729_s13 = smov %s731_s27  ;;  %18 = sbr.rel (!%p16_p10) target bundleno = 7 (0x7), region = 78 }
  0x3f   :  { %240 = vsyncpa [#allocation3], 1 }
  0x40   :  { %242 = vsyncpa [#allocation3 + $0x1], 1 }
  0x41   :  { %243 = vsyncpa [#allocation6], 1 }
  0x42   :  { %244 = vsyncpa [#allocation4], 1 }
  0x43   :  { %246 = vsyncpa [#allocation4 + $0x1], 1 }

</bundles_post_ra>
